<compile_context>
chip_gen: v7x
topology: tpu7x:2x2x1
jax: 0.10.0
libtpu: 0.0.40
codegen_flags: <defaults>
</compile_context>

<pallas_src>
import math
import numpy as np

import jax
import jax.numpy as jnp
from jax.experimental import pallas as pl
from jax.experimental.pallas import tpu as pltpu

INPUT_DIM = 2
HIDDEN_DIM = 16
LATENT_DIM = 64
NUM_HEADS = 2
HEAD_DIM = HIDDEN_DIM // NUM_HEADS
THETA_HIDDEN = 128
THETA_OUT = 4

SLAB_LANES = 128                       # lane width of the packed parameter slab
OUT_ROWS = 128                         # output block rows: latent(64) | theta padded(64)
THETA_PAD = OUT_ROWS - LATENT_DIM      # 64 (>= THETA_OUT)

# (name, rows, cols) of every tensor packed into the slab.  All weights are
# stored TRANSPOSED (out_features, in_features) and biases as columns so the
# kernel computes  act_out = W_t @ act_in + b_col  with points on the lane axis.
_PARAM_SPECS = [
    ("w1t", HIDDEN_DIM, INPUT_DIM),    ("b1c", HIDDEN_DIM, 1),
    ("w2t", HIDDEN_DIM, HIDDEN_DIM),   ("b2c", HIDDEN_DIM, 1),
    ("wvt", HIDDEN_DIM, HIDDEN_DIM),   ("bvc", HIDDEN_DIM, 1),
    # fused score projection: ((wk * q) @ head_mask)^T, ((bk * q) @ head_mask)^T
    ("wst", HIDDEN_DIM, HIDDEN_DIM),   ("bsc", HIDDEN_DIM, 1),
    ("wot", HIDDEN_DIM, HIDDEN_DIM),   ("boc", HIDDEN_DIM, 1),
    ("w3t", LATENT_DIM, HIDDEN_DIM),   ("b3c", LATENT_DIM, 1),
    ("w4t", LATENT_DIM, LATENT_DIM),   ("b4c", LATENT_DIM, 1),
    ("w5t", THETA_HIDDEN, LATENT_DIM), ("b5c", THETA_HIDDEN, 1),
    # theta head zero-padded from 4 to 64 output rows (rows 4:64 MUST stay zero)
    ("w6t", THETA_PAD, THETA_HIDDEN),  ("b6c", THETA_PAD, 1),
]


def _build_layout():
    layout, row = {}, 0
    for name, r, c in _PARAM_SPECS:
        layout[name] = (row, r, c)
        row += -(-r // 8) * 8           # 8-align every start row (sublane tile)
    return layout, row


_LAYOUT, SLAB_ROWS = _build_layout()    # SLAB_ROWS is a multiple of 8


def _kernel(x_ref, slab_ref, out_ref):
    """One batch per grid step; all per-point activations are (16, N) lane-dense."""
    f32 = jnp.float32

    def p(name):
        r0, rows, cols = _LAYOUT[name]
        return slab_ref[r0:r0 + rows, :cols]        # static slice -> plain load

    x = x_ref[...]                                  # (INPUT_DIM, N)

    # ---- mlp1 layer 1 (K = input_dim = 2): VPU broadcast FMAs, skip the MXU ----
    w1t = p("w1t")                                  # (16, INPUT_DIM)
    h = p("b1c")                                    # (16, 1) broadcast along lanes
    for j in range(INPUT_DIM):                      # static 2-iteration loop
        h = h + w1t[:, j:j + 1] * x[j:j + 1, :]
    h = jnp.maximum(h, 0.0)                         # (16, N)

    # ---- mlp1 layer 2 ----
    h = jnp.maximum(
        jnp.dot(p("w2t"), h, preferred_element_type=f32) + p("b2c"), 0.0)   # (16, N)

    # ---- cross-attention: value projection + fused (query-folded) scores ----
    v = jnp.dot(p("wvt"), h, preferred_element_type=f32) + p("bvc")         # (16, N)
    s = jnp.dot(p("wst"), h, preferred_element_type=f32) + p("bsc")         # (16, N)
    # each row of s holds its head's score (broadcast across the head's rows)

    # softmax over the N points (lane axis); normalization deferred to (16,1)
    m = jnp.max(s, axis=-1, keepdims=True)          # (16, 1)
    e = jnp.exp(s - m)                              # (16, N)
    denom = jnp.sum(e, axis=-1, keepdims=True)      # (16, 1)
    acc = jnp.sum(e * v, axis=-1, keepdims=True)    # (16, 1)
    attn = acc / denom                              # (16, 1)

    attended = jnp.dot(p("wot"), attn, preferred_element_type=f32) + p("boc")  # (16, 1)

    # ---- mlp2: Linear -> ReLU -> Linear ----
    l1 = jnp.maximum(
        jnp.dot(p("w3t"), attended, preferred_element_type=f32) + p("b3c"), 0.0)
    latent = jnp.dot(p("w4t"), l1, preferred_element_type=f32) + p("b4c")   # (64, 1)

    # ---- theta regressor (w6t/b6c rows 4:64 are zero => rows 4:64 of theta are 0) ----
    t1 = jnp.maximum(
        jnp.dot(p("w5t"), latent, preferred_element_type=f32) + p("b5c"), 0.0)
    theta = jnp.dot(p("w6t"), t1, preferred_element_type=f32) + p("b6c")    # (64, 1)

    # two static slice stores, no concatenate
    out_ref[:LATENT_DIM, :] = latent
    out_ref[LATENT_DIM:, :] = theta


def init_params(key):
    """Deterministic synthetic parameter init (shapes from the nn.Module __init__)."""
    ks = jax.random.split(key, 21)

    def w(k, shape, scale=0.1):
        return (scale * jax.random.normal(k, shape)).astype(jnp.float32)

    return {
        "w1": w(ks[0], (INPUT_DIM, HIDDEN_DIM)),   "b1": w(ks[1], (1, HIDDEN_DIM)),
        "w2": w(ks[2], (HIDDEN_DIM, HIDDEN_DIM)),  "b2": w(ks[3], (1, HIDDEN_DIM)),
        "tok": w(ks[4], (1, HIDDEN_DIM), scale=1.0),
        "wq": w(ks[5], (HIDDEN_DIM, HIDDEN_DIM)),  "bq": w(ks[6], (1, HIDDEN_DIM)),
        "wk": w(ks[7], (HIDDEN_DIM, HIDDEN_DIM)),  "bk": w(ks[8], (1, HIDDEN_DIM)),
        "wv": w(ks[9], (HIDDEN_DIM, HIDDEN_DIM)),  "bv": w(ks[10], (1, HIDDEN_DIM)),
        "wo": w(ks[11], (HIDDEN_DIM, HIDDEN_DIM)), "bo": w(ks[12], (1, HIDDEN_DIM)),
        "w3": w(ks[13], (HIDDEN_DIM, LATENT_DIM)), "b3": w(ks[14], (1, LATENT_DIM)),
        "w4": w(ks[15], (LATENT_DIM, LATENT_DIM)), "b4": w(ks[16], (1, LATENT_DIM)),
        "w5": w(ks[17], (LATENT_DIM, THETA_HIDDEN)), "b5": w(ks[18], (1, THETA_HIDDEN)),
        "w6": w(ks[19], (THETA_HIDDEN, THETA_OUT)),  "b6": w(ks[20], (1, THETA_OUT)),
    }


def pack_params(params):
    """Fold the query path into the score projection and pack everything into one
    (SLAB_ROWS, 128) f32 slab (weights transposed, biases as columns)."""
    f64 = np.float64

    def g(name):
        return np.asarray(params[name], f64)

    head_id = np.arange(HIDDEN_DIM) // HEAD_DIM
    head_mask = (head_id[:, None] == head_id[None, :]).astype(f64) / math.sqrt(HEAD_DIM)

    # q = tok @ wq + bq is input-independent -> fuse the whole score path:
    #   s = ((h @ wk + bk) * q) @ head_mask  ==  h @ ws + bs
    q = g("tok") @ g("wq") + g("bq")                    # (1, 16)
    ws = (g("wk") * q) @ head_mask                      # (16, 16)
    bs = (g("bk") * q) @ head_mask                      # (1, 16)

    # theta head zero-padded; rows THETA_OUT:THETA_PAD must remain exactly zero.
    w6t = np.zeros((THETA_PAD, THETA_HIDDEN), f64)
    w6t[:THETA_OUT] = g("w6").T
    b6c = np.zeros((THETA_PAD, 1), f64)
    b6c[:THETA_OUT] = g("b6").T

    tensors = {
        "w1t": g("w1").T, "b1c": g("b1").T,
        "w2t": g("w2").T, "b2c": g("b2").T,
        "wvt": g("wv").T, "bvc": g("bv").T,
        "wst": ws.T,      "bsc": bs.T,
        "wot": g("wo").T, "boc": g("bo").T,
        "w3t": g("w3").T, "b3c": g("b3").T,
        "w4t": g("w4").T, "b4c": g("b4").T,
        "w5t": g("w5").T, "b5c": g("b5").T,
        "w6t": w6t,       "b6c": b6c,
    }

    slab = np.zeros((SLAB_ROWS, SLAB_LANES), np.float32)
    for name, rows, cols in _PARAM_SPECS:
        r0, r, c = _LAYOUT[name]
        arr = np.asarray(tensors[name], np.float32)
        assert arr.shape == (r, c), (name, arr.shape, (r, c))
        slab[r0:r0 + r, :c] = arr
    return jnp.asarray(slab)


def pointnet_cross_attention(x, slab):
    B, N, _ = x.shape
    # Lane-dense layout: points on the lane (last) axis, one batch per grid step.
    x_t = jnp.transpose(x, (0, 2, 1)).astype(jnp.float32)        # (B, INPUT_DIM, N)
    out = pl.pallas_call(
        _kernel,
        grid=(B,),
        out_shape=jax.ShapeDtypeStruct((B, OUT_ROWS, 1), jnp.float32),
        in_specs=[
            pl.BlockSpec((None, INPUT_DIM, N), lambda b: (b, 0, 0)),
            pl.BlockSpec((SLAB_ROWS, SLAB_LANES), lambda b: (0, 0)),  # resident slab
        ],
        out_specs=pl.BlockSpec((None, OUT_ROWS, 1), lambda b: (b, 0, 0)),
        compiler_params=pltpu.CompilerParams(dimension_semantics=("parallel",)),
    )(x_t, slab)
    out = out[:, :, 0]                                            # (B, 128)
    latent = out[:, :LATENT_DIM]
    theta = out[:, LATENT_DIM:LATENT_DIM + THETA_OUT]
    return latent, theta


def reference_forward(x, p):
    """Plain-JAX reference (same math as the PyTorch module) for correctness."""
    h = jnp.maximum(jnp.einsum("bnd,dh->bnh", x, p["w1"]) + p["b1"], 0.0)
    h = jnp.maximum(jnp.einsum("bnh,hk->bnk", h, p["w2"]) + p["b2"], 0.0)
    q = p["tok"] @ p["wq"] + p["bq"]
    k = jnp.einsum("bnh,hk->bnk", h, p["wk"]) + p["bk"]
    v = jnp.einsum("bnh,hk->bnk", h, p["wv"]) + p["bv"]
    scale = 1.0 / math.sqrt(HEAD_DIM)
    outs = []
    for hd in range(NUM_HEADS):
        sl = slice(hd * HEAD_DIM, (hd + 1) * HEAD_DIM)
        scores = jnp.einsum("bnh,h->bn", k[:, :, sl], q[0, sl]) * scale
        pw = jax.nn.softmax(scores, axis=-1)
        outs.append(jnp.einsum("bn,bnh->bh", pw, v[:, :, sl]))
    attn = jnp.concatenate(outs, axis=-1)
    attended = attn @ p["wo"] + p["bo"]
    l1 = jnp.maximum(attended @ p["w3"] + p["b3"], 0.0)
    latent = l1 @ p["w4"] + p["b4"]
    t1 = jnp.maximum(latent @ p["w5"] + p["b5"], 0.0)
    theta = t1 @ p["w6"] + p["b6"]
    return latent, theta


if __name__ == "__main__":
    key = jax.random.PRNGKey(0)
    k_param, k_x = jax.random.split(key)
    B, N = 2, 8
    x = jax.random.normal(k_x, (B, N, INPUT_DIM), dtype=jnp.float32)
    params = init_params(k_param)
    slab = pack_params(params)

    latent, theta = pointnet_cross_attention(x, slab)
    jax.block_until_ready((latent, theta))

    latent_ref, theta_ref = reference_forward(x, params)
    assert latent.shape == (B, LATENT_DIM) and theta.shape == (B, THETA_OUT)
    assert jnp.allclose(latent, latent_ref, atol=1e-4, rtol=1e-4)
    assert jnp.allclose(theta, theta_ref, atol=1e-4, rtol=1e-4)
    print("KERNEL_OK")
</pallas_src>

<mosaic_0001>
module attributes {stable_mosaic.version = 11 : i64} {
  func.func @_kernel(%arg0: i32, %arg1: memref<1x2x8xf32, #tpu.memory_space<vmem>>, %arg2: memref<800x128xf32, #tpu.memory_space<vmem>>, %arg3: memref<1x128x1xf32, #tpu.memory_space<vmem>>) attributes {dimension_semantics = [#tpu.dimension_semantics<parallel>], iteration_bounds = array<i64: 2>, scalar_prefetch = 0 : i64, scratch_operands = 0 : i64, tpu.core_type = #tpu.core_type<tc>, window_params = [{transform_indices = @transform_0, window_bounds = array<i64: 1, 2, 8>}, {pipeline_mode = #tpu.pipeline_mode<synchronous>, transform_indices = @transform_1, window_bounds = array<i64: 800, 128>}, {transform_indices = @transform_2, window_bounds = array<i64: 1, 128, 1>}]} {
    %c0 = arith.constant 0 : index
    %c0_0 = arith.constant 0 : index
    %c0_1 = arith.constant 0 : index
    %0 = vector.load %arg1[%c0, %c0_0, %c0_1] : memref<1x2x8xf32, #tpu.memory_space<vmem>>, vector<1x2x8xf32>
    %1 = vector.shape_cast %0 : vector<1x2x8xf32> to vector<2x8xf32>
    %c0_2 = arith.constant 0 : index
    %c0_3 = arith.constant 0 : index
    %2 = vector.load %arg2[%c0_2, %c0_3] : memref<800x128xf32, #tpu.memory_space<vmem>>, vector<16x2xf32>
    %c16 = arith.constant 16 : index
    %c0_4 = arith.constant 0 : index
    %3 = vector.load %arg2[%c16, %c0_4] : memref<800x128xf32, #tpu.memory_space<vmem>>, vector<16x1xf32>
    %4 = vector.extract_strided_slice %2 {offsets = [0, 0], sizes = [16, 1], strides = [1, 1]} : vector<16x2xf32> to vector<16x1xf32>
    %5 = vector.extract_strided_slice %1 {offsets = [0, 0], sizes = [1, 8], strides = [1, 1]} : vector<2x8xf32> to vector<1x8xf32>
    %6 = vector.broadcast %4 : vector<16x1xf32> to vector<16x8xf32>
    %7 = vector.broadcast %5 : vector<1x8xf32> to vector<16x8xf32>
    %8 = arith.mulf %6, %7 : vector<16x8xf32>
    %9 = vector.broadcast %3 : vector<16x1xf32> to vector<16x8xf32>
    %10 = arith.addf %9, %8 : vector<16x8xf32>
    %11 = vector.extract_strided_slice %2 {offsets = [0, 1], sizes = [16, 1], strides = [1, 1]} : vector<16x2xf32> to vector<16x1xf32>
    %12 = vector.extract_strided_slice %1 {offsets = [1, 0], sizes = [1, 8], strides = [1, 1]} : vector<2x8xf32> to vector<1x8xf32>
    %13 = vector.broadcast %11 : vector<16x1xf32> to vector<16x8xf32>
    %14 = vector.broadcast %12 : vector<1x8xf32> to vector<16x8xf32>
    %15 = arith.mulf %13, %14 : vector<16x8xf32>
    %16 = arith.addf %10, %15 : vector<16x8xf32>
    %cst = arith.constant 0.000000e+00 : f32
    %17 = vector.broadcast %cst : f32 to vector<16x8xf32>
    %18 = arith.maximumf %16, %17 : vector<16x8xf32>
    %c32 = arith.constant 32 : index
    %c0_5 = arith.constant 0 : index
    %19 = vector.load %arg2[%c32, %c0_5] : memref<800x128xf32, #tpu.memory_space<vmem>>, vector<16x16xf32>
    %cst_6 = arith.constant dense<0.000000e+00> : vector<16x8xf32>
    %20 = tpu.matmul %19, %18, %cst_6 {dimension_numbers = #tpu.dot_dimension_numbers<[1], [0], [0], [1], [0, 0, 1, 1], [], []>} : vector<16x16xf32>, vector<16x8xf32>, vector<16x8xf32> -> vector<16x8xf32>
    %c48 = arith.constant 48 : index
    %c0_7 = arith.constant 0 : index
    %21 = vector.load %arg2[%c48, %c0_7] : memref<800x128xf32, #tpu.memory_space<vmem>>, vector<16x1xf32>
    %22 = vector.broadcast %21 : vector<16x1xf32> to vector<16x8xf32>
    %23 = arith.addf %20, %22 : vector<16x8xf32>
    %cst_8 = arith.constant 0.000000e+00 : f32
    %24 = vector.broadcast %cst_8 : f32 to vector<16x8xf32>
    %25 = arith.maximumf %23, %24 : vector<16x8xf32>
    %c64 = arith.constant 64 : index
    %c0_9 = arith.constant 0 : index
    %26 = vector.load %arg2[%c64, %c0_9] : memref<800x128xf32, #tpu.memory_space<vmem>>, vector<16x16xf32>
    %cst_10 = arith.constant dense<0.000000e+00> : vector<16x8xf32>
    %27 = tpu.matmul %26, %25, %cst_10 {dimension_numbers = #tpu.dot_dimension_numbers<[1], [0], [0], [1], [0, 0, 1, 1], [], []>} : vector<16x16xf32>, vector<16x8xf32>, vector<16x8xf32> -> vector<16x8xf32>
    %c80 = arith.constant 80 : index
    %c0_11 = arith.constant 0 : index
    %28 = vector.load %arg2[%c80, %c0_11] : memref<800x128xf32, #tpu.memory_space<vmem>>, vector<16x1xf32>
    %29 = vector.broadcast %28 : vector<16x1xf32> to vector<16x8xf32>
    %30 = arith.addf %27, %29 : vector<16x8xf32>
    %c96 = arith.constant 96 : index
    %c0_12 = arith.constant 0 : index
    %31 = vector.load %arg2[%c96, %c0_12] : memref<800x128xf32, #tpu.memory_space<vmem>>, vector<16x16xf32>
    %cst_13 = arith.constant dense<0.000000e+00> : vector<16x8xf32>
    %32 = tpu.matmul %31, %25, %cst_13 {dimension_numbers = #tpu.dot_dimension_numbers<[1], [0], [0], [1], [0, 0, 1, 1], [], []>} : vector<16x16xf32>, vector<16x8xf32>, vector<16x8xf32> -> vector<16x8xf32>
    %c112 = arith.constant 112 : index
    %c0_14 = arith.constant 0 : index
    %33 = vector.load %arg2[%c112, %c0_14] : memref<800x128xf32, #tpu.memory_space<vmem>>, vector<16x1xf32>
    %34 = vector.broadcast %33 : vector<16x1xf32> to vector<16x8xf32>
    %35 = arith.addf %32, %34 : vector<16x8xf32>
    %cst_15 = arith.constant dense<0xFF800000> : vector<16xf32>
    %36 = vector.multi_reduction <maximumf>, %35, %cst_15 [1] : vector<16x8xf32> to vector<16xf32>
    %37 = vector.shape_cast %36 : vector<16xf32> to vector<16x1xf32>
    %38 = vector.broadcast %37 : vector<16x1xf32> to vector<16x8xf32>
    %39 = arith.subf %35, %38 : vector<16x8xf32>
    %40 = math.exp %39 : vector<16x8xf32>
    %cst_16 = arith.constant dense<0.000000e+00> : vector<16xf32>
    %41 = vector.multi_reduction <add>, %40, %cst_16 [1] : vector<16x8xf32> to vector<16xf32>
    %42 = vector.shape_cast %41 : vector<16xf32> to vector<16x1xf32>
    %43 = arith.mulf %40, %30 : vector<16x8xf32>
    %cst_17 = arith.constant dense<0.000000e+00> : vector<16xf32>
    %44 = vector.multi_reduction <add>, %43, %cst_17 [1] : vector<16x8xf32> to vector<16xf32>
    %45 = vector.shape_cast %44 : vector<16xf32> to vector<16x1xf32>
    %46 = arith.divf %45, %42 : vector<16x1xf32>
    %c128 = arith.constant 128 : index
    %c0_18 = arith.constant 0 : index
    %47 = vector.load %arg2[%c128, %c0_18] : memref<800x128xf32, #tpu.memory_space<vmem>>, vector<16x16xf32>
    %cst_19 = arith.constant dense<0.000000e+00> : vector<16x1xf32>
    %48 = tpu.matmul %47, %46, %cst_19 {dimension_numbers = #tpu.dot_dimension_numbers<[1], [0], [0], [1], [0, 0, 1, 1], [], []>} : vector<16x16xf32>, vector<16x1xf32>, vector<16x1xf32> -> vector<16x1xf32>
    %c144 = arith.constant 144 : index
    %c0_20 = arith.constant 0 : index
    %49 = vector.load %arg2[%c144, %c0_20] : memref<800x128xf32, #tpu.memory_space<vmem>>, vector<16x1xf32>
    %50 = arith.addf %48, %49 : vector<16x1xf32>
    %c160 = arith.constant 160 : index
    %c0_21 = arith.constant 0 : index
    %51 = vector.load %arg2[%c160, %c0_21] : memref<800x128xf32, #tpu.memory_space<vmem>>, vector<64x16xf32>
    %cst_22 = arith.constant dense<0.000000e+00> : vector<64x1xf32>
    %52 = tpu.matmul %51, %50, %cst_22 {dimension_numbers = #tpu.dot_dimension_numbers<[1], [0], [0], [1], [0, 0, 1, 1], [], []>} : vector<64x16xf32>, vector<16x1xf32>, vector<64x1xf32> -> vector<64x1xf32>
    %c224 = arith.constant 224 : index
    %c0_23 = arith.constant 0 : index
    %53 = vector.load %arg2[%c224, %c0_23] : memref<800x128xf32, #tpu.memory_space<vmem>>, vector<64x1xf32>
    %54 = arith.addf %52, %53 : vector<64x1xf32>
    %cst_24 = arith.constant 0.000000e+00 : f32
    %55 = vector.broadcast %cst_24 : f32 to vector<64x1xf32>
    %56 = arith.maximumf %54, %55 : vector<64x1xf32>
    %c288 = arith.constant 288 : index
    %c0_25 = arith.constant 0 : index
    %57 = vector.load %arg2[%c288, %c0_25] : memref<800x128xf32, #tpu.memory_space<vmem>>, vector<64x64xf32>
    %cst_26 = arith.constant dense<0.000000e+00> : vector<64x1xf32>
    %58 = tpu.matmul %57, %56, %cst_26 {dimension_numbers = #tpu.dot_dimension_numbers<[1], [0], [0], [1], [0, 0, 1, 1], [], []>} : vector<64x64xf32>, vector<64x1xf32>, vector<64x1xf32> -> vector<64x1xf32>
    %c352 = arith.constant 352 : index
    %c0_27 = arith.constant 0 : index
    %59 = vector.load %arg2[%c352, %c0_27] : memref<800x128xf32, #tpu.memory_space<vmem>>, vector<64x1xf32>
    %60 = arith.addf %58, %59 : vector<64x1xf32>
    %c416 = arith.constant 416 : index
    %c0_28 = arith.constant 0 : index
    %61 = vector.load %arg2[%c416, %c0_28] : memref<800x128xf32, #tpu.memory_space<vmem>>, vector<128x64xf32>
    %cst_29 = arith.constant dense<0.000000e+00> : vector<128x1xf32>
    %62 = tpu.matmul %61, %60, %cst_29 {dimension_numbers = #tpu.dot_dimension_numbers<[1], [0], [0], [1], [0, 0, 1, 1], [], []>} : vector<128x64xf32>, vector<64x1xf32>, vector<128x1xf32> -> vector<128x1xf32>
    %c544 = arith.constant 544 : index
    %c0_30 = arith.constant 0 : index
    %63 = vector.load %arg2[%c544, %c0_30] : memref<800x128xf32, #tpu.memory_space<vmem>>, vector<128x1xf32>
    %64 = arith.addf %62, %63 : vector<128x1xf32>
    %cst_31 = arith.constant 0.000000e+00 : f32
    %65 = vector.broadcast %cst_31 : f32 to vector<128x1xf32>
    %66 = arith.maximumf %64, %65 : vector<128x1xf32>
    %c672 = arith.constant 672 : index
    %c0_32 = arith.constant 0 : index
    %67 = vector.load %arg2[%c672, %c0_32] : memref<800x128xf32, #tpu.memory_space<vmem>>, vector<64x128xf32>
    %cst_33 = arith.constant dense<0.000000e+00> : vector<64x1xf32>
    %68 = tpu.matmul %67, %66, %cst_33 {dimension_numbers = #tpu.dot_dimension_numbers<[1], [0], [0], [1], [0, 0, 1, 1], [], []>} : vector<64x128xf32>, vector<128x1xf32>, vector<64x1xf32> -> vector<64x1xf32>
    %c736 = arith.constant 736 : index
    %c0_34 = arith.constant 0 : index
    %69 = vector.load %arg2[%c736, %c0_34] : memref<800x128xf32, #tpu.memory_space<vmem>>, vector<64x1xf32>
    %70 = arith.addf %68, %69 : vector<64x1xf32>
    %c0_35 = arith.constant 0 : index
    %c0_36 = arith.constant 0 : index
    %c0_37 = arith.constant 0 : index
    %71 = vector.load %arg3[%c0_35, %c0_36, %c0_37] : memref<1x128x1xf32, #tpu.memory_space<vmem>>, vector<1x64x1xf32>
    %72 = vector.shape_cast %71 : vector<1x64x1xf32> to vector<64x1xf32>
    %73 = vector.shape_cast %60 : vector<64x1xf32> to vector<1x64x1xf32>
    tpu.vector_store %arg3[%c0_35, %c0_36, %c0_37], %73 {strides = array<i32>} : memref<1x128x1xf32, #tpu.memory_space<vmem>>, vector<1x64x1xf32>,
    %c0_38 = arith.constant 0 : index
    %c64_39 = arith.constant 64 : index
    %c0_40 = arith.constant 0 : index
    %74 = vector.load %arg3[%c0_38, %c64_39, %c0_40] : memref<1x128x1xf32, #tpu.memory_space<vmem>>, vector<1x64x1xf32>
    %75 = vector.shape_cast %74 : vector<1x64x1xf32> to vector<64x1xf32>
    %76 = vector.shape_cast %70 : vector<64x1xf32> to vector<1x64x1xf32>
    tpu.vector_store %arg3[%c0_38, %c64_39, %c0_40], %76 {strides = array<i32>} : memref<1x128x1xf32, #tpu.memory_space<vmem>>, vector<1x64x1xf32>,
    return
  }
  func.func @transform_0(%arg0: i32) -> (i32, i32, i32) {
    %c0_i32 = arith.constant 0 : i32
    %c0_i32_0 = arith.constant 0 : i32
    %c0_i32_1 = arith.constant 0 : i32
    return %arg0, %c0_i32, %c0_i32_0 : i32, i32, i32
  }
  func.func @transform_1(%arg0: i32) -> (i32, i32) {
    %c0_i32 = arith.constant 0 : i32
    %c0_i32_0 = arith.constant 0 : i32
    %c0_i32_1 = arith.constant 0 : i32
    return %c0_i32, %c0_i32_0 : i32, i32
  }
  func.func @transform_2(%arg0: i32) -> (i32, i32, i32) {
    %c0_i32 = arith.constant 0 : i32
    %c0_i32_0 = arith.constant 0 : i32
    %c0_i32_1 = arith.constant 0 : i32
    return %arg0, %c0_i32, %c0_i32_0 : i32, i32, i32
  }
}

</mosaic_0001>

<bundles_post_ra>
// kernel: tpu_custom_call.1
= control target key start
LH: loop header
LB: loop body
LE: loop exit
PB: predicated region body
PF: predicated region fallthrough
CT: control target
= control target key end

     0   :  { %7 = vsyncpa [#allocation3], 0  ;;  %s2181_s0 = inlined_call_operand.hbm [shape: f32[2,2,8], index: 0, kind: input, shape index: {}]   ;;  %s2182_s1 = inlined_call_operand.hbm [shape: f32[800,128], index: 1, kind: input, shape index: {}]   ;;  %s2183_s2 = inlined_call_operand.vmem [shape: f32[2,128,1], index: 2, kind: output, shape index: {}]  }
   0x1   :  { %9 = vsyncpa [#allocation3 + $0x1], 0 }
   0x2   :  { %10 = vsyncpa [#allocation5], 0  ;;  %s1957_s9 = smov 0   ;;  %s1959_s10 = smov 0  }
   0x3   :  { %s1961_s11 = smov 0   ;;  %s1963_s12 = smov 0  }
   0x4 LB: > { %s1976_s13 = sadd.s32 4294967295, %s1934_s12   ;;  %p36_p0 = scmp.ne.s32.totalorder %s1926_s10, %s1922_s9  ;;  %s1934_s12 = sphi %s1963_s12, %s2198_s12   ;;  %s1930_s11 = sphi %s1961_s11, %s2197_s11   ;;  %s1926_s10 = sphi %s1959_s10, %s2196_s10   ;;  %s1922_s9 = sphi %s1957_s9, %s2195_s9  }
   0x5   : > { %p2184_p1 = scmp.eq.s32.totalorder %s1976_s13, 0  ;;  %p1387_p2 = scmp.ge.s32.totalorder %s1934_s12, 1 }
   0x6   : > { %p94_p3 = scmp.lt.s32.totalorder %s1934_s12, 3  ;;  %s1936_s16 = smov [#allocation4]  }
   0x7   : > { %p1984_p4 = por %p2184_p1, %p36_p0  ;;  %s106_s17 = sshll.u32 %s1936_s16, 4  ;;  %s107_s17 = int_to_ptr.vmem [resolvable:$true] %s106_s17 }
   0x8   : > { %p1988_p5 = pnand %p1387_p2, %p94_p3  ;;  %s2001_s19 = sadd.s32 1, %s1934_s12  }
   0x9   : > { %s2187_s14 = scalar_select %p1984_p4, 1, 0 }
   0xa   : > { %s2188_s15 = scalar_select %p1988_p5, 1, 0 }
   0xb   : > { %p1776_p6 = pneg %p1988_p5  ;;  %s23_s20 = sadd.s32 1, %s1930_s11 }
   0xc   : > { %s20_s21 = ssub.s32 %s1934_s12, %s2001_s19  ;;  %s1838_s24 = scalar_lea.hbm %s2182_s1, 12800 }
   0xd   : > { %p1996_p7 = pnand %p1776_p6, %p2184_p1  ;;  %p1839_p8 = scmp.ne.s32.totalorder %s2182_s1, %s1838_s24 }
   0xe   : > { %p1845_p12 = scmp.lt.u32.totalorder %s1838_s24, %s2182_s1 }
   0xf   : > { %p1840_p9 = pneg %p1996_p7 }
  0x11   : > { %p1841_p10 = pnand %p1840_p9, %p1839_p8 }
  0x13   : > { %p1842_p11 = pneg %p1841_p10 }
  0x15   : > { %p1847_p13 = pnand %p1845_p12, %p1842_p11 }
  0x17   : > { %1850 = shalt.err (!%p1847_p13)
}
  0x18   : > { %s1851_s29 = scalar_lea.vmem %s107_s17, 12800  ;;  %p1859_p6 = scmp.lt.s32.totalorder %s107_s17, %s107_s17 }
  0x19   : > { %p1852_p0 = scmp.ne.s32.totalorder %s107_s17, %s1851_s29  ;;  %p1860_p1 = scmp.lt.s32.totalorder %s1851_s29, %s1851_s29 }
  0x1b   : > { %p1854_p2 = pnand %p1852_p0, %p1840_p9  ;;  %p1861_p4 = por %p1860_p1, %p1859_p6 }
  0x1d   : > { %p1855_p3 = pneg %p1854_p2 }
  0x1f   : > { %p1862_p5 = pnand %p1861_p4, %p1855_p3 }
  0x21   : > { %1865 = shalt.err (!%p1862_p5)
}
  0x22   : > { %s1937_s30 = smov 128   ;;  %s1938_s3 = smov 8  }
  0x23   : > { %1779 = dma.hbm_to_vmem [thread:$0]  (!%p1996_p7), %s2182_s1, 12800, %s107_s17, [#allocation5], %s1937_s30, %s1937_s30, %s1938_s3  }
  0x24   : > { %p21_p8 = scmp.eq.s32.totalorder %s20_s21, 0  ;;  %p30_p9 = scmp.ne.s32.totalorder %s1930_s11, %s1926_s10 }
  0x25   : > { %p31_p1 = scmp.eq.s32.totalorder %s1934_s12, 0  ;;  %p1785_p4 = scmp.lt.s32.totalorder %s1934_s12, 2 }
  0x26   : > { %s2027_s6 = scalar_select %p21_p8, %s1930_s11, %s23_s20  }
  0x27   : > { %p32_p5 = por %p31_p1, %p30_p9  ;;  %s120_s7 = sand.u32 1, %s1930_s11  }
  0x28   : > { %s1390_s8 = sshll.u32 %s120_s7, 1  ;;  %s1391_s9 = sshll.u32 %s1934_s12, 5 }
  0x29   : > { %s2034_s23 = scalar_lea.hbm %s2181_s0, %s1391_s9  ;;  %s124_s17 = scalar_lea.vmem [#allocation2], %s1390_s8 }
  0x2a   : > { %s131_s18 = sshll.u32 %s124_s17, 4  ;;  %p2038_p7 = pnand %p1785_p4, %p32_p5  ;;  %s2036_s18 = int_to_ptr.vmem [resolvable:$true] %s131_s18 }
  0x2b   : > { %s121_s12 = scalar_lea.sflag [#allocation3], %s120_s7  ;;  %s1866_s21 = scalar_lea.hbm %s2034_s23, 32 }
  0x2c   : > { %p1867_p10 = scmp.ne.s32.totalorder %s2034_s23, %s1866_s21  ;;  %p1868_p11 = pneg %p2038_p7 }
  0x2d   : > { %s1871_s26 = scalar_lea.hbm %s2181_s0, 64  ;;  %p1872_p0 = scmp.lt.u32.totalorder %s2034_s23, %s2181_s0 }
  0x2e   : > { %p1869_p12 = pnand %p1868_p11, %p1867_p10  ;;  %p1873_p2 = scmp.lt.u32.totalorder %s1871_s26, %s1866_s21 }
  0x2f   : > { %p1875_p6 = scmp.lt.u32.totalorder %s1866_s21, %s2034_s23 }
  0x30   : > { %p1870_p13 = pneg %p1869_p12  ;;  %p1874_p3 = por %p1873_p2, %p1872_p0 }
  0x32   : > { %p1876_p8 = por %p1875_p6, %p1874_p3 }
  0x34   : > { %p1877_p9 = pnand %p1876_p8, %p1870_p13 }
  0x36   : > { %1880 = shalt.err (!%p1877_p9)
}
  0x37   : > { %s1881_s29 = scalar_lea.vmem %s2036_s18, 32  ;;  %s1939_s30 = smov [#allocation2]  }
  0x38   : > { %p1882_p1 = scmp.ne.s32.totalorder %s2036_s18, %s1881_s29  ;;  %s1886_s3 = sshll.u32 %s1939_s30, 4  ;;  %s1887_s3 = int_to_ptr.vmem [resolvable:$false] %s1886_s3 }
  0x39   : > { %s1888_s4 = scalar_lea.vmem %s1887_s3, 64  ;;  %p1889_p10 = scmp.lt.s32.totalorder %s2036_s18, %s1887_s3 }
  0x3a   : > { %p1884_p4 = pnand %p1882_p1, %p1868_p11  ;;  %p1890_p12 = scmp.lt.s32.totalorder %s1888_s4, %s1881_s29 }
  0x3c   : > { %p1885_p5 = pneg %p1884_p4  ;;  %p1891_p0 = por %p1890_p12, %p1889_p10 }
  0x3e   : > { %p1892_p2 = pnand %p1891_p0, %p1885_p5 }
  0x40   : > { %1895 = shalt.err (!%p1892_p2)
}
  0x41   : > { %1783 = dma.hbm_to_vmem [thread:$0]  (!%p2038_p7), %s2034_s23, 32, %s2036_s18, %s121_s12  }
  0x42   : > { %p2191_p13 = scmp.ne.s32.totalorder %s2188_s15, 0 }
  0x43   : > { %s142_s5 = sand.u32 (!%p2191_p13), 1, %s1926_s10   ;;  %p2192_p11 = scmp.ne.s32.totalorder (!%p2191_p13), %s2187_s14, 0 }
  0x44   : > { %140 = sbr.rel (%p2191_p13) target bundleno = 2160 (0x870), region = 28  ;;  %s2070_s7 = sshll.u32 (!%p2191_p13), %s142_s5, 1 }
  0x45   : > { %s143_s8 = scalar_lea.sflag (!%p2191_p13), [#allocation3], %s142_s5  ;;  %s146_s9 = scalar_lea.vmem (!%p2191_p13), [#allocation2], %s2070_s7 }
  0x4b   : > { %1913 = dma.done.wait (%p2192_p11), %s143_s8, 32  }
  0x4c   : > { %1915 = vsyncadd (%p2192_p11), %s143_s8, 4294967264  ;;  %p2193_p3 = scmp.eq.s32.totalorder %s1976_s13, 0 }
  0x4e   : > { %1917 = dma.done.wait (%p2193_p3), [#allocation5], 12800   ;;  %p2194_p7 = pmov %p2193_p3 }
  0x4f   : > { %v1940_v0 = vmov 0   ;;  %v179_v1 = vld [vmem:[#allocation4 + $0x10] sm:$0xff]  ;;  %v177_v2 = vld [vmem:[#allocation4] sm:$0xff]  ;;  %v180_v3 = vld [vmem:[#allocation4 + $0x18] sm:$0xff]  ;;  %v1941_v5 = vmov 1   ;;  %vm241_vm0 = vcmask 130048   ;;  %v191_v11 = vlaneseq }
  0x50   : > { %1919 = vsyncadd (%p2194_p7), [#allocation5], 4294954496  ;;  %1825 = vset.pattern.permute.xlu1 %v1940_v0  ;;  %1824 = vset.pattern.permute.xlu0 %v1940_v0  ;;  %v178_v4 = vld [vmem:[#allocation4 + $0x8] sm:$0xff]  ;;  %v227_v6 = vld [vmem:[#allocation4 + $0x20] sm:$0xff]  ;;  %vm515_vm1 = vcmask 64512   ;;  %vm800_vm2 = vcmask 523264  }
  0x51   : > { %199 = vperm.xlu1 %1825, %v179_v1   ;;  %183 = vperm.xlu0 %1824, %v177_v2   ;;  %v229_v7 = vld [vmem:[#allocation4 + $0x30] sm:$0xff]  ;;  %v230_v8 = vld [vmem:[#allocation4 + $0x38] sm:$0xff]  ;;  %v192_v12 = vshrl.u32 %v191_v11, 7  ;;  %v228_v35 = vld [vmem:[#allocation4 + $0x28] sm:$0xff]  ;;  %p171_p6 = scmp.lt.s32.totalorder %s1976_s13, 1  ;;  %vm1292_vm3 = vcmask 7168  }
  0x52   : > { %1534 = vmatprep.mubr.msk.f32.mxu0 %vm241_vm0, %v227_v6  ;;  %v422_v9 = vld [vmem:[#allocation4 + $0x70] sm:$0xff]  ;;  %v423_v10 = vld [vmem:[#allocation4 + $0x78] sm:$0xff]  ;;  %v325_v36 = vld [vmem:[#allocation4 + $0x40] sm:$0xff] }
  0x53   : > { %v193_v13 = vsub.s32 0, %v192_v12  ;;  %v176_v14 = vld [vmem:[%s146_s9] sm:$0x3]  ;;  %v219_v18 = vsub.s32 1, %v192_v12  ;;  %v326_v46 = vld [vmem:[#allocation4 + $0x48] sm:$0xff]  ;;  %v420_v47 = vld [vmem:[#allocation4 + $0x60] sm:$0xff] }
  0x54   : > { %v421_v48 = vld [vmem:[#allocation4 + $0x68] sm:$0xff]  ;;  %v328_v59 = vld [vmem:[#allocation4 + $0x58] sm:$0xff]  ;;  %v327_v60 = vld [vmem:[#allocation4 + $0x50] sm:$0xff]  ;;  %s2200_s13 = smov (!%p171_p6, %s1976_s13), 1 }
  0x55   : > { %204 = vperm.xlu1 %1825, %v180_v3   ;;  %188 = vperm.xlu0 %1824, %v178_v4   ;;  %v194_v17 = vrot.slane %v176_v14, %v193_v13  ;;  %v220_v23 = vrot.slane %v176_v14, %v219_v18  ;;  %s1439_s14 = sshll.u32 %s2200_s13, 7 }
  0x56   : > { %s2119_s22 = scalar_lea.vmem %s2183_s2, %s1439_s14 }
  0x59   : > { %1827 = vset.pattern.permute.xlu1 %v1941_v5  ;;  %1826 = vset.pattern.permute.xlu0 %v1941_v5 }
  0x5a   : > { %214 = vperm.xlu1 %1827, %v178_v4   ;;  %210 = vperm.xlu0 %1826, %v177_v2  }
  0x5e   : > { %1828 = vset.pattern.permute.xlu1 %v1940_v0  ;;  %1829 = vset.pattern.permute.xlu0 %v1940_v0 }
  0x5f   : > { %233 = vperm.xlu1 %1828, %v229_v7   ;;  %238 = vperm.xlu0 %1829, %v230_v8  }
  0x63   : > { %426 = vperm.xlu1 %1828, %v422_v9  }
  0x67   : > { %431 = vperm.xlu1 %1828, %v423_v10  }
  0xd0   : > { %v200_v15 = vpop.permute.xlu1 %199  ;;  %v184_v16 = vpop.permute.xlu0 %183 }
  0xd1   : > { %v195_v21 = vmul.f32 %v194_v17, %v184_v16 }
  0xd3   : > { %v207_v26 = vadd.f32 %v200_v15, %v195_v21  ;;  %v546_v15 = vld [vmem:[#allocation4 + $0x80] sm:$0xff] }
  0xd4   : > { %v205_v19 = vpop.permute.xlu1 %204  ;;  %v189_v20 = vpop.permute.xlu0 %188  ;;  %1555 = vmatprep.mubr.msk.f32.mxu1 %vm241_vm0, %v546_v15  ;;  %v786_v15 = vld [vmem:[#allocation4 + $0x130] sm:$0xff] }
  0xd5   : > { %v196_v22 = vmul.f32 %v194_v17, %v189_v20 }
  0xd7   : > { %v208_v27 = vadd.f32 %v205_v19, %v196_v22 }
  0xd9   : > { %v215_v24 = vpop.permute.xlu1 %214  ;;  %v211_v25 = vpop.permute.xlu0 %210 }
  0xda   : > { %v222_v28 = vmul.f32 %v220_v23, %v215_v24  ;;  %v221_v29 = vmul.f32 %v220_v23, %v211_v25  ;;  %v547_v25 = vld [vmem:[#allocation4 + $0x88] sm:$0xff] }
  0xdc   : > { %v224_v30 = vadd.f32 %v222_v28, %v208_v27  ;;  %v223_v31 = vadd.f32 %v221_v29, %v207_v26  ;;  %v631_v26 = vld [vmem:[#allocation4 + $0xa0] sm:$0xff]  ;;  %v549_v27 = vld [vmem:[#allocation4 + $0x98] sm:$0xff]  ;;  %v548_v28 = vld [vmem:[#allocation4 + $0x90] sm:$0xff] }
  0xde   : > { %v226_v32 = vmax.f32 %v224_v30, 0.0  ;;  %v225_v33 = vmax.f32 %v223_v31, 0.0  ;;  %v239_v37 = vpop.permute.xlu0 %238  ;;  %v234_v39 = vpop.permute.xlu1 %233 }
  0xe0   : > { %v1686_v34 = vpack.c.bf16 %v226_v32, %v225_v33 }
  0xe2   : > { %1687 = vmatprep.subr.bf16.mxu0 %v1686_v34  ;;  %v427_v49 = vpop.permute.xlu1 %426 }
  0xe3   : > { %1689 = vmatpush3.bf16.msra.mxu0 %v1686_v34  ;;  %v632_v34 = vld [vmem:[#allocation4 + $0xa8] sm:$0xff] }
  0xe6   : > { %1535 = vmatmul.mubr.msk.f32.vlgmr.msra.gmra.mrb[0].mxu0 %vm241_vm0, %v228_v35  ;;  %v432_v52 = vpop.permute.xlu1 %431  ;;  %v633_v35 = vld [vmem:[#allocation4 + $0xb0] sm:$0xff] }
  0xe7   : > { %1541 = vmatprep.mubr.msk.f32.mxu0 %vm241_vm0, %v325_v36  ;;  %v634_v36 = vld [vmem:[#allocation4 + $0xb8] sm:$0xff] }
 0x1b9   : > { %v1536_v38 = vpop.f32.mrb[0].mxu0 }
 0x1ba   : > { %v320_v40 = vadd.f32 %v1536_v38, %v239_v37  ;;  %v314_v41 = vpop.f32.mrb[1].mxu0  ;;  %v635_v37 = vld [vmem:[#allocation4 + $0xc0] sm:$0xff]  ;;  %v636_v38 = vld [vmem:[#allocation4 + $0xc8] sm:$0xff] }
 0x1bb   : > { %v315_v42 = vadd.f32 %v314_v41, %v234_v39  ;;  %v637_v39 = vld [vmem:[#allocation4 + $0xd0] sm:$0xff]  ;;  %v784_v41 = vld [vmem:[#allocation4 + $0x120] sm:$0xff] }
 0x1bc   : > { %v324_v43 = vmax.f32 %v320_v40, 0.0  ;;  %v638_v40 = vld [vmem:[#allocation4 + $0xd8] sm:$0xff] }
 0x1bd   : > { %v323_v44 = vmax.f32 %v315_v42, 0.0  ;;  %v640_v42 = vld [vmem:[#allocation4 + $0xe8] sm:$0xff] }
 0x1bf   : > { %v1690_v45 = vpack.c.bf16 %v324_v43, %v323_v44  ;;  %v639_v43 = vld [vmem:[#allocation4 + $0xe0] sm:$0xff] }
 0x1c1   : > { %1691 = vmatprep.subr.bf16.mxu0 %v1690_v45 }
 0x1c2   : > { %1693 = vmatpush3.bf16.msra.mxu0 %v1690_v45 }
 0x1c3   : > { %1695 = vmatprep.subr.bf16.mxu0 %v1690_v45 }
 0x1c5   : > { %1542 = vmatmul.mubr.msk.f32.vlgmr.msra.gmra.mrb[2].mxu0 %vm241_vm0, %v326_v46 }
 0x1c6   : > { %1697 = vmatpush3.bf16.msra.mxu0 %v1690_v45  ;;  %1548 = vmatprep.mubr.msk.f32.mxu0 %vm241_vm0, %v420_v47 }
 0x1c9   : > { %1549 = vmatmul.mubr.msk.f32.vlgmr.msra.gmra.mrb[4].mxu0 %vm241_vm0, %v421_v48  ;;  %v642_v48 = vld [vmem:[#allocation4 + $0xf8] sm:$0xff] }
 0x1ca   : > { %1562 = vmatprep.mubr.msk.f32.mxu0 %vm241_vm0, %v631_v26 }
 0x298   : > { %v1543_v50 = vpop.f32.mrb[2].mxu0 }
 0x299   : > { %v411_v51 = vpop.f32.mrb[3].mxu0 }
 0x29c   : > { %v1550_v53 = vpop.f32.mrb[4].mxu0 }
 0x29d   : > { %v512_v54 = vadd.f32 %v1550_v53, %v432_v52  ;;  %v506_v55 = vpop.f32.mrb[5].mxu0 }
 0x29e   : > { %v507_v56 = vadd.f32 %v506_v55, %v427_v49 }
 0x29f   : > { %v519_v57 = vsel %vm515_vm1, %v512_v54, -inf }
 0x2a0   : > { %520 = vmax.xlane.f32.xlu1 %v519_v57  ;;  %v516_v58 = vsel %vm515_vm1, %v507_v56, -inf  ;;  %v644_v57 = vld [vmem:[#allocation4 + $0x108] sm:$0xff] }
 0x2a1   : > { %517 = vmax.xlane.f32.xlu0 %v516_v58 }
 0x2b1   : > { %336 = vperm.xlu1 %1828, %v328_v59   ;;  %v643_v59 = vld [vmem:[#allocation4 + $0x100] sm:$0xff] }
 0x2b7   : > { %331 = vperm.xlu0 %1829, %v327_v60  }
 0x32d   : > { %v521_v61 = vpop.xlane.xlu1 %520 }
 0x32e   : > { %v523_v62 = vsub.f32 %v512_v54, %v521_v61  ;;  %v518_v63 = vpop.xlane.xlu0 %517 }
 0x32f   : > { %v522_v0 = vsub.f32 %v507_v56, %v518_v63 }
 0x330   : > { %v526_v1 = vmul.f32 1.442695, %v523_v62 }
 0x331   : > { %v524_v2 = vmul.f32 1.442695, %v522_v0  ;;  %v337_v7 = vpop.permute.xlu1 %336 }
 0x332   : > { %1830 = vpow2.f32 %v526_v1  ;;  %v417_v11 = vadd.f32 %v1543_v50, %v337_v7  ;;  %v641_v50 = vld [vmem:[#allocation4 + $0xf0] sm:$0xff] }
 0x333   : > { %1832 = vpow2.f32 %v524_v2  ;;  %v646_v2 = vld [vmem:[#allocation4 + $0x118] sm:$0xff] }
 0x336   : > { %v332_v3 = vpop.permute.xlu0 %331 }
 0x337   : > { %v412_v5 = vadd.f32 %v411_v51, %v332_v3 }
 0x33c   : > { %v1831_v4 = vpop.eup %1830 }
 0x33d   : > { %v1833_v6 = vpop.eup %1832  ;;  %v531_v8 = vsel %vm515_vm1, %v1831_v4, 0.0  ;;  %v535_v13 = vmul.f32 %v1831_v4, %v417_v11  ;;  %v645_v4 = vld [vmem:[#allocation4 + $0x110] sm:$0xff] }
 0x33e   : > { %532 = vadd.xlane.f32.xlu1 %v531_v8  ;;  %v528_v9 = vsel %vm515_vm1, %v1833_v6, 0.0  ;;  %v534_v10 = vmul.f32 %v1833_v6, %v412_v5 }
 0x33f   : > { %529 = vadd.xlane.f32.xlu0 %v528_v9  ;;  %v539_v14 = vsel %vm515_vm1, %v535_v13, 0.0 }
 0x340   : > { %v536_v12 = vsel %vm515_vm1, %v534_v10, 0.0 }
 0x343   : > { %537 = vadd.xlane.f32.xlu0 %v536_v12 }
 0x347   : > { %540 = vadd.xlane.f32.xlu0 %v539_v14  ;;  %v785_v14 = vld [vmem:[#allocation4 + $0x128] sm:$0xff] }
 0x3cb   : > { %v533_v16 = vpop.xlane.xlu1 %532 }
 0x3cc   : > { %1834 = vrcp.f32 %v533_v16  ;;  %v530_v17 = vpop.xlane.xlu0 %529  ;;  %v787_v16 = vld [vmem:[#allocation4 + $0x138] sm:$0xff] }
 0x3cd   : > { %1836 = vrcp.f32 %v530_v17  ;;  %v788_v17 = vld [vmem:[#allocation4 + $0x140] sm:$0xff] }
 0x3d0   : > { %v538_v18 = vpop.xlane.xlu0 %537 }
 0x3d4   : > { %v541_v20 = vpop.xlane.xlu0 %540 }
 0x3d6   : > { %v1835_v19 = vpop.eup %1834 }
 0x3d7   : > { %v1837_v21 = vpop.eup %1836  ;;  %v545_v22 = vmul.f32 %v1835_v19, %v541_v20  ;;  %v790_v19 = vld [vmem:[#allocation4 + $0x150] sm:$0xff]  ;;  %v791_v20 = vld [vmem:[#allocation4 + $0x158] sm:$0xff] }
 0x3d8   : > { %v543_v23 = vmul.f32 %v1837_v21, %v538_v18  ;;  %v789_v18 = vld [vmem:[#allocation4 + $0x148] sm:$0xff]  ;;  %v930_v21 = vld [vmem:[#allocation4 + $0x1a0] sm:$0xff] }
 0x3da   : > { %v1698_v24 = vpack.c.bf16 %v545_v22, %v543_v23  ;;  %v793_v22 = vld [vmem:[#allocation4 + $0x168] sm:$0xff]  ;;  %v792_v23 = vld [vmem:[#allocation4 + $0x160] sm:$0xff] }
 0x3dc   : > { %1699 = vmatprep.subr.bf16.mxu1 %v1698_v24 }
 0x3dd   : > { %1701 = vmatpush3.bf16.msra.mxu1 %v1698_v24 }
 0x3e0   : > { %1556 = vmatmul.mubr.msk.f32.vlgmr.msra.gmra.mrb[0].mxu1 %vm241_vm0, %v547_v25 }
 0x3e1   : > { %1590 = vmatprep.mubr.msk.f32.mxu1 %vm800_vm2, %v784_v41 }
 0x4b3   : > { %v1557_v29 = vpop.f32.mrb[0].mxu1 }
 0x4b4   : > { %v628_v30 = vadd.f32 %v1557_v29, %v549_v27  ;;  %v622_v31 = vpop.f32.mrb[1].mxu1  ;;  %v794_v29 = vld [vmem:[#allocation4 + $0x170] sm:$0xff] }
 0x4b5   : > { %v623_v32 = vadd.f32 %v622_v31, %v548_v28  ;;  %v795_v28 = vld [vmem:[#allocation4 + $0x178] sm:$0xff] }
 0x4b7   : > { %v1702_v33 = vpack.c.bf16 %v628_v30, %v623_v32 }
 0x4b9   : > { %1703 = vmatprep.subr.bf16.mxu0 %v1702_v33 }
 0x4ba   : > { %1705 = vmatpush3.bf16.msra.mxu0 %v1702_v33 }
 0x4bd   : > { %1563 = vmatmul.mubr.msk.f32.vlgmr.msra.gmra.mrb[6].mxu0 %vm241_vm0, %v632_v34 }
 0x4be   : > { %1565 = vmatprep.mubr.msk.f32.mxu0 %vm241_vm0, %v633_v35  ;;  %v797_v35 = vld [vmem:[#allocation4 + $0x188] sm:$0xff] }
 0x4c1   : > { %1566 = vmatmul.mubr.msk.f32.gmra.mrb[8].mxu0 %vm241_vm0, %v634_v36  ;;  %v796_v36 = vld [vmem:[#allocation4 + $0x180] sm:$0xff] }
 0x4c2   : > { %1568 = vmatprep.mubr.msk.f32.mxu0 %vm241_vm0, %v635_v37 }
 0x4c5   : > { %1569 = vmatmul.mubr.msk.f32.gmra.mrb[10].mxu0 %vm241_vm0, %v636_v38 }
 0x4c6   : > { %1571 = vmatprep.mubr.msk.f32.mxu0 %vm241_vm0, %v637_v39 }
 0x4c9   : > { %1572 = vmatmul.mubr.msk.f32.gmra.mrb[12].mxu0 %vm241_vm0, %v638_v40 }
 0x4ca   : > { %1618 = vmatprep.mubr.msk.f32.mxu0 %vm800_vm2, %v930_v21 }
 0x590   : > { %v1564_v44 = vpop.f32.mrb[6].mxu0 }
 0x591   : > { %v743_v45 = vadd.f32 %v1564_v44, %v640_v42  ;;  %v737_v46 = vpop.f32.mrb[7].mxu0  ;;  %v799_v42 = vld [vmem:[#allocation4 + $0x198] sm:$0xff] }
 0x592   : > { %v738_v47 = vadd.f32 %v737_v46, %v639_v43  ;;  %v798_v43 = vld [vmem:[#allocation4 + $0x190] sm:$0xff] }
 0x593   : > { %v777_v49 = vmax.f32 %v743_v45, 0.0 }
 0x594   : > { %v776_v51 = vmax.f32 %v738_v47, 0.0  ;;  %v1567_v52 = vpop.f32.mrb[8].mxu0 }
 0x595   : > { %v753_v53 = vadd.f32 %v1567_v52, %v642_v48  ;;  %v747_v54 = vpop.f32.mrb[9].mxu0  ;;  %v933_v52 = vld [vmem:[#allocation4 + $0x1b8] sm:$0xff] }
 0x596   : > { %v1706_v55 = vpack.c.bf16 %v777_v49, %v776_v51  ;;  %v748_v56 = vadd.f32 %v747_v54, %v641_v50  ;;  %v931_v50 = vld [vmem:[#allocation4 + $0x1a8] sm:$0xff]  ;;  %v932_v51 = vld [vmem:[#allocation4 + $0x1b0] sm:$0xff] }
 0x597   : > { %v779_v58 = vmax.f32 %v753_v53, 0.0  ;;  %v934_v53 = vld [vmem:[#allocation4 + $0x1c0] sm:$0xff]  ;;  %v935_v54 = vld [vmem:[#allocation4 + $0x1c8] sm:$0xff] }
 0x598   : > { %v778_v60 = vmax.f32 %v748_v56, 0.0  ;;  %v1570_v61 = vpop.f32.mrb[10].mxu0  ;;  %1707 = vmatprep.subr.bf16.mxu1 %v1706_v55  ;;  %v937_v56 = vld [vmem:[#allocation4 + $0x1d8] sm:$0xff] }
 0x599   : > { %v763_v62 = vadd.f32 %v1570_v61, %v644_v57  ;;  %v757_v63 = vpop.f32.mrb[11].mxu0  ;;  %1709 = vmatpush3.bf16.msra.mxu1 %v1706_v55  ;;  %v936_v55 = vld [vmem:[#allocation4 + $0x1d0] sm:$0xff]  ;;  %v938_v57 = vld [vmem:[#allocation4 + $0x1e0] sm:$0xff] }
 0x59a   : > { %v1710_v0 = vpack.c.bf16 %v779_v58, %v778_v60  ;;  %v758_v1 = vadd.f32 %v757_v63, %v643_v59  ;;  %v939_v58 = vld [vmem:[#allocation4 + $0x1e8] sm:$0xff]  ;;  %v940_v59 = vld [vmem:[#allocation4 + $0x1f0] sm:$0xff]  ;;  %v941_v60 = vld [vmem:[#allocation4 + $0x1f8] sm:$0xff] }
 0x59b   : > { %v781_v3 = vmax.f32 %v763_v62, 0.0  ;;  %v942_v61 = vld [vmem:[#allocation4 + $0x200] sm:$0xff]  ;;  %v943_v62 = vld [vmem:[#allocation4 + $0x208] sm:$0xff]  ;;  %v944_v63 = vld [vmem:[#allocation4 + $0x210] sm:$0xff] }
 0x59c   : > { %v780_v5 = vmax.f32 %v758_v1, 0.0  ;;  %v1573_v6 = vpop.f32.mrb[12].mxu0  ;;  %1711 = vmatprep.subr.bf16.mxu1 %v1710_v0  ;;  %v1171_v1 = vld [vmem:[#allocation4 + $0x2a0] sm:$0xff] }
 0x59d   : > { %v773_v7 = vadd.f32 %v1573_v6, %v646_v2  ;;  %v767_v8 = vpop.f32.mrb[13].mxu0  ;;  %1713 = vmatpush3.bf16.msra.mxu1 %v1710_v0  ;;  %v945_v0 = vld [vmem:[#allocation4 + $0x218] sm:$0xff]  ;;  %v947_v2 = vld [vmem:[#allocation4 + $0x228] sm:$0xff] }
 0x59e   : > { %v1714_v9 = vpack.c.bf16 %v781_v3, %v780_v5  ;;  %v768_v10 = vadd.f32 %v767_v8, %v645_v4  ;;  %v946_v3 = vld [vmem:[#allocation4 + $0x220] sm:$0xff]  ;;  %v949_v8 = vld [vmem:[#allocation4 + $0x238] sm:$0xff] }
 0x59f   : > { %v783_v11 = vmax.f32 %v773_v7, 0.0 }
 0x5a0   : > { %v782_v12 = vmax.f32 %v768_v10, 0.0  ;;  %1715 = vmatprep.subr.bf16.mxu1 %v1714_v9  ;;  %v948_v10 = vld [vmem:[#allocation4 + $0x230] sm:$0xff] }
 0x5a1   : > { %1717 = vmatpush3.bf16.msra.mxu1 %v1714_v9 }
 0x5a2   : > { %v1718_v13 = vpack.c.bf16 %v783_v11, %v782_v12 }
 0x5a4   : > { %1719 = vmatprep.subr.bf16.mxu1 %v1718_v13 }
 0x5a5   : > { %1721 = vmatpush3.bf16.msra.mxu1 %v1718_v13 }
 0x5a8   : > { %1591 = vmatmul.mubr.msk.f32.vlgmr.msra.gmra.mrb[2].mxu1 %vm800_vm2, %v785_v14 }
 0x5a9   : > { %1593 = vmatprep.mubr.msk.f32.mxu1 %vm800_vm2, %v786_v15 }
 0x5ac   : > { %1594 = vmatmul.mubr.msk.f32.gmra.mrb[4].mxu1 %vm800_vm2, %v787_v16 }
 0x5ad   : > { %1596 = vmatprep.mubr.msk.f32.mxu1 %vm800_vm2, %v788_v17  ;;  %v951_v17 = vld [vmem:[#allocation4 + $0x248] sm:$0xff] }
 0x5b0   : > { %1597 = vmatmul.mubr.msk.f32.gmra.mrb[6].mxu1 %vm800_vm2, %v789_v18 }
 0x5b1   : > { %1599 = vmatprep.mubr.msk.f32.mxu1 %vm800_vm2, %v790_v19  ;;  %v950_v19 = vld [vmem:[#allocation4 + $0x240] sm:$0xff] }
 0x5b4   : > { %1600 = vmatmul.mubr.msk.f32.gmra.mrb[8].mxu1 %vm800_vm2, %v791_v20 }
 0x5b5   : > { %1674 = vmatprep.mubr.f32.mxu1 %v1171_v1 }
 0x67b   : > { %v1592_v24 = vpop.f32.mrb[2].mxu1 }
 0x67c   : > { %v897_v25 = vadd.f32 %v1592_v24, %v793_v22  ;;  %v891_v26 = vpop.f32.mrb[3].mxu1 }
 0x67d   : > { %v892_v27 = vadd.f32 %v891_v26, %v792_v23  ;;  %v953_v26 = vld [vmem:[#allocation4 + $0x258] sm:$0xff] }
 0x67e   : > { %1294 = vst.msk [vmem:[%s2119_s22 + $0x8] sm:$0xff] %vm1292_vm3, %v897_v25 }
 0x67f   : > { %v1722_v30 = vpack.c.bf16 %v897_v25, %v892_v27  ;;  %1293 = vst.msk [vmem:[%s2119_s22] sm:$0xff] %vm1292_vm3, %v892_v27  ;;  %v1595_v31 = vpop.f32.mrb[4].mxu1 }
 0x680   : > { %v907_v32 = vadd.f32 %v1595_v31, %v795_v28  ;;  %v901_v33 = vpop.f32.mrb[5].mxu1  ;;  %v952_v28 = vld [vmem:[#allocation4 + $0x250] sm:$0xff] }
 0x681   : > { %v902_v34 = vadd.f32 %v901_v33, %v794_v29  ;;  %1723 = vmatprep.subr.bf16.mxu0 %v1722_v30 }
 0x682   : > { %1296 = vst.msk [vmem:[%s2119_s22 + $0x18] sm:$0xff] %vm1292_vm3, %v907_v32  ;;  %1725 = vmatpush3.bf16.msra.mxu0 %v1722_v30 }
 0x683   : > { %v1726_v37 = vpack.c.bf16 %v907_v32, %v902_v34  ;;  %1295 = vst.msk [vmem:[%s2119_s22 + $0x10] sm:$0xff] %vm1292_vm3, %v902_v34  ;;  %v1598_v38 = vpop.f32.mrb[6].mxu1 }
 0x684   : > { %v917_v39 = vadd.f32 %v1598_v38, %v797_v35  ;;  %v911_v40 = vpop.f32.mrb[7].mxu1  ;;  %v955_v35 = vld [vmem:[#allocation4 + $0x268] sm:$0xff] }
 0x685   : > { %v912_v41 = vadd.f32 %v911_v40, %v796_v36  ;;  %1727 = vmatprep.subr.bf16.mxu0 %v1726_v37 }
 0x686   : > { %1298 = vst.msk [vmem:[%s2119_s22 + $0x28] sm:$0xff] %vm1292_vm3, %v917_v39  ;;  %1729 = vmatpush3.bf16.msra.mxu0 %v1726_v37  ;;  %v954_v37 = vld [vmem:[#allocation4 + $0x260] sm:$0xff] }
 0x687   : > { %v1730_v44 = vpack.c.bf16 %v917_v39, %v912_v41  ;;  %1297 = vst.msk [vmem:[%s2119_s22 + $0x20] sm:$0xff] %vm1292_vm3, %v912_v41  ;;  %v1601_v45 = vpop.f32.mrb[8].mxu1 }
 0x688   : > { %v927_v46 = vadd.f32 %v1601_v45, %v799_v42  ;;  %v921_v47 = vpop.f32.mrb[9].mxu1 }
 0x689   : > { %v922_v48 = vadd.f32 %v921_v47, %v798_v43  ;;  %1731 = vmatprep.subr.bf16.mxu0 %v1730_v44 }
 0x68a   : > { %1300 = vst.msk [vmem:[%s2119_s22 + $0x38] sm:$0xff] %vm1292_vm3, %v927_v46  ;;  %1733 = vmatpush3.bf16.msra.mxu0 %v1730_v44  ;;  %v957_v44 = vld [vmem:[#allocation4 + $0x278] sm:$0xff] }
 0x68b   : > { %v1734_v49 = vpack.c.bf16 %v927_v46, %v922_v48  ;;  %1299 = vst.msk [vmem:[%s2119_s22 + $0x30] sm:$0xff] %vm1292_vm3, %v922_v48  ;;  %v956_v46 = vld [vmem:[#allocation4 + $0x270] sm:$0xff] }
 0x68d   : > { %1735 = vmatprep.subr.bf16.mxu0 %v1734_v49 }
 0x68e   : > { %1737 = vmatpush3.bf16.msra.mxu0 %v1734_v49 }
 0x691   : > { %1619 = vmatmul.mubr.msk.f32.vlgmr.msra.gmra.mrb[14].mxu0 %vm800_vm2, %v931_v50 }
 0x692   : > { %1621 = vmatprep.mubr.msk.f32.mxu0 %vm800_vm2, %v932_v51 }
 0x695   : > { %1622 = vmatmul.mubr.msk.f32.gmra.mrb[16].mxu0 %vm800_vm2, %v933_v52 }
 0x696   : > { %1624 = vmatprep.mubr.msk.f32.mxu0 %vm800_vm2, %v934_v53  ;;  %v959_v53 = vld [vmem:[#allocation4 + $0x288] sm:$0xff] }
 0x699   : > { %1625 = vmatmul.mubr.msk.f32.gmra.mrb[18].mxu0 %vm800_vm2, %v935_v54 }
 0x69a   : > { %1627 = vmatprep.mubr.msk.f32.mxu0 %vm800_vm2, %v936_v55  ;;  %v958_v55 = vld [vmem:[#allocation4 + $0x280] sm:$0xff] }
 0x69d   : > { %1628 = vmatmul.mubr.msk.f32.gmra.mrb[20].mxu0 %vm800_vm2, %v937_v56 }
 0x69e   : > { %1630 = vmatprep.mubr.msk.f32.mxu0 %vm800_vm2, %v938_v57 }
 0x6a1   : > { %1631 = vmatmul.mubr.msk.f32.gmra.mrb[22].mxu0 %vm800_vm2, %v939_v58 }
 0x6a2   : > { %1633 = vmatprep.mubr.msk.f32.mxu0 %vm800_vm2, %v940_v59 }
 0x6a5   : > { %1634 = vmatmul.mubr.msk.f32.gmra.mrb[24].mxu0 %vm800_vm2, %v941_v60 }
 0x6a6   : > { %1636 = vmatprep.mubr.msk.f32.mxu0 %vm800_vm2, %v942_v61 }
 0x6a9   : > { %1637 = vmatmul.mubr.msk.f32.gmra.mrb[26].mxu0 %vm800_vm2, %v943_v62  ;;  %v961_v62 = vld [vmem:[#allocation4 + $0x298] sm:$0xff] }
 0x6aa   : > { %1639 = vmatprep.mubr.msk.f32.mxu0 %vm800_vm2, %v944_v63 }
 0x6ad   : > { %1640 = vmatmul.mubr.msk.f32.gmra.mrb[28].mxu0 %vm800_vm2, %v945_v0  ;;  %v960_v0 = vld [vmem:[#allocation4 + $0x290] sm:$0xff] }
 0x764   : > { %v1620_v4 = vpop.f32.mrb[14].mxu0 }
 0x765   : > { %v1082_v5 = vadd.f32 %v1620_v4, %v947_v2  ;;  %v1076_v6 = vpop.f32.mrb[15].mxu0 }
 0x766   : > { %v1077_v7 = vadd.f32 %v1076_v6, %v946_v3 }
 0x767   : > { %v1156_v9 = vmax.f32 %v1082_v5, 0.0 }
 0x768   : > { %v1155_v11 = vmax.f32 %v1077_v7, 0.0  ;;  %v1623_v12 = vpop.f32.mrb[16].mxu0 }
 0x769   : > { %v1092_v13 = vadd.f32 %v1623_v12, %v949_v8  ;;  %v1086_v14 = vpop.f32.mrb[17].mxu0  ;;  %v1174_v12 = vld [vmem:[#allocation4 + $0x2b8] sm:$0xff] }
 0x76a   : > { %v1738_v15 = vpack.c.bf16 %v1156_v9, %v1155_v11  ;;  %v1087_v16 = vadd.f32 %v1086_v14, %v948_v10  ;;  %v1172_v10 = vld [vmem:[#allocation4 + $0x2a8] sm:$0xff]  ;;  %v1173_v11 = vld [vmem:[#allocation4 + $0x2b0] sm:$0xff] }
 0x76b   : > { %v1158_v18 = vmax.f32 %v1092_v13, 0.0  ;;  %v1175_v13 = vld [vmem:[#allocation4 + $0x2c0] sm:$0xff]  ;;  %v1176_v14 = vld [vmem:[#allocation4 + $0x2c8] sm:$0xff] }
 0x76c   : > { %v1157_v20 = vmax.f32 %v1087_v16, 0.0  ;;  %v1626_v21 = vpop.f32.mrb[18].mxu0  ;;  %1739 = vmatprep.subr.bf16.mxu1 %v1738_v15  ;;  %v1178_v16 = vld [vmem:[#allocation4 + $0x2d8] sm:$0xff] }
 0x76d   : > { %v1102_v22 = vadd.f32 %v1626_v21, %v951_v17  ;;  %v1096_v23 = vpop.f32.mrb[19].mxu0  ;;  %1741 = vmatpush3.bf16.msra.mxu1 %v1738_v15  ;;  %v1177_v15 = vld [vmem:[#allocation4 + $0x2d0] sm:$0xff]  ;;  %v1180_v17 = vld [vmem:[#allocation4 + $0x2e8] sm:$0xff] }
 0x76e   : > { %v1742_v24 = vpack.c.bf16 %v1158_v18, %v1157_v20  ;;  %v1097_v25 = vadd.f32 %v1096_v23, %v950_v19  ;;  %v1179_v18 = vld [vmem:[#allocation4 + $0x2e0] sm:$0xff]  ;;  %v1182_v23 = vld [vmem:[#allocation4 + $0x2f8] sm:$0xff] }
 0x76f   : > { %v1160_v27 = vmax.f32 %v1102_v22, 0.0 }
 0x770   : > { %v1159_v29 = vmax.f32 %v1097_v25, 0.0  ;;  %v1629_v30 = vpop.f32.mrb[20].mxu0  ;;  %1743 = vmatprep.subr.bf16.mxu1 %v1742_v24 }
 0x771   : > { %v1112_v31 = vadd.f32 %v1629_v30, %v953_v26  ;;  %v1106_v32 = vpop.f32.mrb[21].mxu0  ;;  %1745 = vmatpush3.bf16.msra.mxu1 %v1742_v24  ;;  %v1181_v24 = vld [vmem:[#allocation4 + $0x2f0] sm:$0xff]  ;;  %v1183_v30 = vld [vmem:[#allocation4 + $0x300] sm:$0xff] }
 0x772   : > { %v1746_v33 = vpack.c.bf16 %v1160_v27, %v1159_v29  ;;  %v1107_v34 = vadd.f32 %v1106_v32, %v952_v28  ;;  %v1184_v29 = vld [vmem:[#allocation4 + $0x308] sm:$0xff] }
 0x773   : > { %v1162_v36 = vmax.f32 %v1112_v31, 0.0 }
 0x774   : > { %v1161_v38 = vmax.f32 %v1107_v34, 0.0  ;;  %v1632_v39 = vpop.f32.mrb[22].mxu0  ;;  %1747 = vmatprep.subr.bf16.mxu1 %v1746_v33 }
 0x775   : > { %v1122_v40 = vadd.f32 %v1632_v39, %v955_v35  ;;  %v1116_v41 = vpop.f32.mrb[23].mxu0  ;;  %1749 = vmatpush3.bf16.msra.mxu1 %v1746_v33  ;;  %v1186_v35 = vld [vmem:[#allocation4 + $0x318] sm:$0xff] }
 0x776   : > { %v1750_v42 = vpack.c.bf16 %v1162_v36, %v1161_v38  ;;  %v1117_v43 = vadd.f32 %v1116_v41, %v954_v37  ;;  %v1185_v36 = vld [vmem:[#allocation4 + $0x310] sm:$0xff] }
 0x777   : > { %v1164_v45 = vmax.f32 %v1122_v40, 0.0 }
 0x778   : > { %v1163_v47 = vmax.f32 %v1117_v43, 0.0  ;;  %v1635_v48 = vpop.f32.mrb[24].mxu0  ;;  %1751 = vmatprep.subr.bf16.mxu1 %v1750_v42 }
 0x779   : > { %v1132_v49 = vadd.f32 %v1635_v48, %v957_v44  ;;  %v1126_v50 = vpop.f32.mrb[25].mxu0  ;;  %1753 = vmatpush3.bf16.msra.mxu1 %v1750_v42 }
 0x77a   : > { %v1754_v51 = vpack.c.bf16 %v1164_v45, %v1163_v47  ;;  %v1127_v52 = vadd.f32 %v1126_v50, %v956_v46 }
 0x77b   : > { %v1166_v54 = vmax.f32 %v1132_v49, 0.0 }
 0x77c   : > { %v1165_v56 = vmax.f32 %v1127_v52, 0.0  ;;  %v1638_v57 = vpop.f32.mrb[26].mxu0  ;;  %1755 = vmatprep.subr.bf16.mxu1 %v1754_v51 }
 0x77d   : > { %v1142_v58 = vadd.f32 %v1638_v57, %v959_v53  ;;  %v1136_v59 = vpop.f32.mrb[27].mxu0  ;;  %1757 = vmatpush3.bf16.msra.mxu1 %v1754_v51 }
 0x77e   : > { %v1758_v60 = vpack.c.bf16 %v1166_v54, %v1165_v56  ;;  %v1137_v61 = vadd.f32 %v1136_v59, %v958_v55 }
 0x77f   : > { %v1168_v63 = vmax.f32 %v1142_v58, 0.0 }
 0x780   : > { %v1167_v1 = vmax.f32 %v1137_v61, 0.0  ;;  %v1641_v2 = vpop.f32.mrb[28].mxu0  ;;  %1759 = vmatprep.subr.bf16.mxu1 %v1758_v60 }
 0x781   : > { %v1152_v3 = vadd.f32 %v1641_v2, %v961_v62  ;;  %v1146_v4 = vpop.f32.mrb[29].mxu0  ;;  %1761 = vmatpush3.bf16.msra.mxu1 %v1758_v60 }
 0x782   : > { %v1762_v5 = vpack.c.bf16 %v1168_v63, %v1167_v1  ;;  %v1147_v6 = vadd.f32 %v1146_v4, %v960_v0 }
 0x783   : > { %v1170_v7 = vmax.f32 %v1152_v3, 0.0 }
 0x784   : > { %v1169_v8 = vmax.f32 %v1147_v6, 0.0  ;;  %1763 = vmatprep.subr.bf16.mxu1 %v1762_v5 }
 0x785   : > { %1765 = vmatpush3.bf16.msra.mxu1 %v1762_v5 }
 0x786   : > { %v1766_v9 = vpack.c.bf16 %v1170_v7, %v1169_v8 }
 0x788   : > { %1767 = vmatprep.subr.bf16.mxu1 %v1766_v9 }
 0x789   : > { %1769 = vmatpush3.bf16.msra.mxu1 %v1766_v9 }
 0x78c   : > { %1675 = vmatmul.mubr.f32.vlgmr.msra.gmra.mrb[10].mxu1 %v1172_v10 }
 0x78d   : > { %1677 = vmatprep.mubr.f32.mxu1 %v1173_v11 }
 0x790   : > { %1678 = vmatmul.mubr.f32.gmra.mrb[12].mxu1 %v1174_v12 }
 0x791   : > { %1680 = vmatprep.mubr.f32.mxu1 %v1175_v13 }
 0x794   : > { %1681 = vmatmul.mubr.f32.gmra.mrb[14].mxu1 %v1176_v14 }
 0x795   : > { %1683 = vmatprep.mubr.f32.mxu1 %v1177_v15 }
 0x798   : > { %1684 = vmatmul.mubr.f32.gmra.mrb[16].mxu1 %v1178_v16 }
 0x85f   : > { %v1676_v19 = vpop.f32.mrb[10].mxu1 }
 0x860   : > { %v1259_v20 = vadd.f32 %v1676_v19, %v1180_v17  ;;  %v1253_v21 = vpop.f32.mrb[11].mxu1 }
 0x861   : > { %v1254_v22 = vadd.f32 %v1253_v21, %v1179_v18 }
 0x862   : > { %1302 = vst.msk [vmem:[%s2119_s22 + $0x48] sm:$0xff] %vm1292_vm3, %v1259_v20 }
 0x863   : > { %1301 = vst.msk [vmem:[%s2119_s22 + $0x40] sm:$0xff] %vm1292_vm3, %v1254_v22  ;;  %v1679_v25 = vpop.f32.mrb[12].mxu1 }
 0x864   : > { %v1269_v26 = vadd.f32 %v1679_v25, %v1182_v23  ;;  %v1263_v27 = vpop.f32.mrb[13].mxu1 }
 0x865   : > { %v1264_v28 = vadd.f32 %v1263_v27, %v1181_v24 }
 0x866   : > { %1304 = vst.msk [vmem:[%s2119_s22 + $0x58] sm:$0xff] %vm1292_vm3, %v1269_v26 }
 0x867   : > { %1303 = vst.msk [vmem:[%s2119_s22 + $0x50] sm:$0xff] %vm1292_vm3, %v1264_v28  ;;  %v1682_v31 = vpop.f32.mrb[14].mxu1 }
 0x868   : > { %v1279_v32 = vadd.f32 %v1682_v31, %v1184_v29  ;;  %v1273_v33 = vpop.f32.mrb[15].mxu1 }
 0x869   : > { %v1274_v34 = vadd.f32 %v1273_v33, %v1183_v30 }
 0x86a   : > { %1306 = vst.msk [vmem:[%s2119_s22 + $0x68] sm:$0xff] %vm1292_vm3, %v1279_v32 }
 0x86b   : > { %1305 = vst.msk [vmem:[%s2119_s22 + $0x60] sm:$0xff] %vm1292_vm3, %v1274_v34  ;;  %v1685_v37 = vpop.f32.mrb[16].mxu1 }
 0x86c   : > { %v1289_v38 = vadd.f32 %v1685_v37, %v1186_v35  ;;  %v1283_v39 = vpop.f32.mrb[17].mxu1 }
 0x86d   : > { %v1284_v40 = vadd.f32 %v1283_v39, %v1185_v36 }
 0x86e   : > { %1308 = vst.msk [vmem:[%s2119_s22 + $0x78] sm:$0xff] %vm1292_vm3, %v1289_v38 }
 0x86f   : > { %1307 = vst.msk [vmem:[%s2119_s22 + $0x70] sm:$0xff] %vm1292_vm3, %v1284_v40 }
 0x870 PF: > { %p13_p8 = scmp.ge.s32.totalorder %s2001_s19, 4   ;;  %s2195_s9 = smov %s1926_s10 }
 0x871   : > { %s2196_s10 = smov %s1930_s11  ;;  %s2197_s11 = smov %s2027_s6 }
 0x872   : > { %s2198_s12 = smov %s2001_s19  ;;  %15 = sbr.rel (!%p13_p8) target bundleno = 4 (0x4), region = 72 }
 0x879   :  { %1330 = vsyncpa [#allocation3], 1 }
 0x87a   :  { %1332 = vsyncpa [#allocation3 + $0x1], 1 }
 0x87b   :  { %1333 = vsyncpa [#allocation5], 1 }

</bundles_post_ra>
